<compile_context>
chip_gen: v7x
topology: tpu7x:2x2x1
jax: 0.10.0
libtpu: 0.0.40
codegen_flags: <defaults>
</compile_context>

<pallas_src>
import math

import numpy as np
import jax
import jax.numpy as jnp
from jax.experimental import pallas as pl
from jax.experimental.pallas import tpu as pltpu


# ---------------------------------------------------------------------------
# Fused Pallas kernel: all pyramid branches, one (batch element, C-tile) per grid step.
# ---------------------------------------------------------------------------
def _ppm_fused_kernel(x_ref, pT_ref, w_ref, b_ref, m_ref, uT_ref, o_ref, z_acc):
    # x_ref : (C_tile, HW)  bf16  input features (channels-major, flat spatial)
    # pT_ref: (HW, S2)      bf16  transposed, row-concatenated adaptive-avg-pool matrices
    # w_ref : (4R, C_tile)  bf16  stacked folded 1x1-conv weights (BN scale folded in)
    # b_ref : (4R, 1)       f32   stacked folded BN biases
    # m_ref : (4R, S2)      f32   block-diagonal mask (branch b <-> its own s^2 pooled cells)
    # uT_ref: (S2, HW)      bf16  transposed, column-concatenated bilinear upsample matrices
    # o_ref : (4R, HW)            fused branch outputs (channels-major => lane-dense store)
    # z_acc : (4R, S2)      f32   VMEM accumulator over C tiles
    c_idx = pl.program_id(1)

    @pl.when(c_idx == 0)
    def _init():
        z_acc[...] = jnp.zeros_like(z_acc)

    # Adaptive avg pool (transposed): (C_tile, S2)
    pooled_t = jnp.dot(x_ref[...], pT_ref[...], preferred_element_type=jnp.float32)
    # 1x1 conv partial sum over this channel tile: (4R, S2)
    z_acc[...] += jnp.dot(w_ref[...], pooled_t.astype(jnp.bfloat16),
                          preferred_element_type=jnp.float32)

    @pl.when(c_idx == pl.num_programs(1) - 1)
    def _finalize():
        # BN bias + ReLU at the pooled resolution, mask off cross-branch products,
        # then one fused bilinear upsample for all branches.
        y = jnp.maximum(z_acc[...] + b_ref[...], 0.0) * m_ref[...]          # (4R, S2) f32
        o_ref[...] = jnp.dot(y.astype(jnp.bfloat16), uT_ref[...],
                             preferred_element_type=jnp.float32).astype(o_ref.dtype)


def _pick_c_tile(C):
    """Channel tile so that (C_tile, HW) input blocks stay VMEM-friendly on v7x."""
    if C <= 512:
        return C
    for t in (512, 256, 128):
        if C % t == 0:
            return t
    return C


def _ppm_fused(x_ncl, pool_t, w_all, b_all, mask, up_t, out_dtype):
    N, C, HW = x_ncl.shape
    S2 = pool_t.shape[1]
    R4 = w_all.shape[0]
    c_tile = _pick_c_tile(C)
    n_c = C // c_tile

    return pl.pallas_call(
        _ppm_fused_kernel,
        out_shape=jax.ShapeDtypeStruct((N, R4, HW), out_dtype),
        grid=(N, n_c),
        in_specs=[
            pl.BlockSpec((None, c_tile, HW), lambda n, c: (n, c, 0)),   # x
            pl.BlockSpec((HW, S2), lambda n, c: (0, 0)),                # P_all^T (grid-invariant)
            pl.BlockSpec((R4, c_tile), lambda n, c: (0, c)),            # W_all
            pl.BlockSpec((R4, 1), lambda n, c: (0, 0)),                 # bias
            pl.BlockSpec((R4, S2), lambda n, c: (0, 0)),                # block-diag mask
            pl.BlockSpec((S2, HW), lambda n, c: (0, 0)),                # U_all^T (grid-invariant)
        ],
        out_specs=pl.BlockSpec((None, R4, HW), lambda n, c: (n, 0, 0)),
        scratch_shapes=[pltpu.VMEM((R4, S2), jnp.float32)],
        compiler_params=pltpu.CompilerParams(
            dimension_semantics=("parallel", "arbitrary")),
    )(x_ncl, pool_t, w_all, b_all, mask, up_t)


# ---------------------------------------------------------------------------
# Host-side construction of the (linear) adaptive-pool and bilinear-upsample operators.
# ---------------------------------------------------------------------------
def _adaptive_avg_pool_matrix(H, W, s):
    """Matrix P of shape (s*s, H*W): pooled = P @ flat(x)  (PyTorch AdaptiveAvgPool2d)."""
    P = np.zeros((s * s, H * W), dtype=np.float32)
    for i in range(s):
        h0 = (i * H) // s
        h1 = -((-(i + 1) * H) // s)  # ceil((i+1)*H / s)
        for j in range(s):
            w0 = (j * W) // s
            w1 = -((-(j + 1) * W) // s)
            cnt = (h1 - h0) * (w1 - w0)
            for hh in range(h0, h1):
                for ww in range(w0, w1):
                    P[i * s + j, hh * W + ww] = 1.0 / cnt
    return P


def _bilinear_upsample_matrix(s, H, W):
    """Matrix U of shape (H*W, s*s): up = U @ flat(y), PyTorch bilinear, align_corners=False."""
    U = np.zeros((H * W, s * s), dtype=np.float32)
    scale_h = s / H
    scale_w = s / W

    def src_and_weights(dst, scale, size):
        src = (dst + 0.5) * scale - 0.5
        src = max(src, 0.0)
        i0 = int(math.floor(src))
        i0 = min(i0, size - 1)
        i1 = min(i0 + 1, size - 1)
        l1 = src - i0
        l0 = 1.0 - l1
        return i0, i1, l0, l1

    for h in range(H):
        h0, h1, lh0, lh1 = src_and_weights(h, scale_h, s)
        for w in range(W):
            w0, w1, lw0, lw1 = src_and_weights(w, scale_w, s)
            row = h * W + w
            U[row, h0 * s + w0] += lh0 * lw0
            U[row, h0 * s + w1] += lh0 * lw1
            U[row, h1 * s + w0] += lh1 * lw0
            U[row, h1 * s + w1] += lh1 * lw1
    return U


def init_ppm_params(key, in_dim, reduction_dim, setting):
    """Deterministic per-branch parameters: conv weight + BN (gamma, beta, mean, var)."""
    params = []
    for idx, _ in enumerate(setting):
        k = jax.random.fold_in(key, idx)
        kw, kg, kb = jax.random.split(k, 3)
        conv_w = jax.random.normal(kw, (reduction_dim, in_dim), jnp.float32) * 0.1
        gamma = 1.0 + 0.05 * jax.random.normal(kg, (reduction_dim,), jnp.float32)
        beta = 0.05 * jax.random.normal(kb, (reduction_dim,), jnp.float32)
        run_mean = jnp.linspace(-0.1, 0.1, reduction_dim, dtype=jnp.float32)
        run_var = jnp.linspace(0.9, 1.1, reduction_dim, dtype=jnp.float32)
        params.append(dict(conv_w=conv_w, gamma=gamma, beta=beta,
                           run_mean=run_mean, run_var=run_var))
    return params


def pyramid_pooling_module(x_nchw, params, setting, eps=1e-5):
    """Forward pass of _PyramidPoolingModule (eval-mode BN).  x_nchw: (N, C, H, W)."""
    N, C, H, W = x_nchw.shape
    HW = H * W
    R = params[0]["conv_w"].shape[0]

    # Fused (concatenated) pool / upsample operators, built once on host.
    P_all = np.concatenate([_adaptive_avg_pool_matrix(H, W, s) for s in setting], axis=0)      # (S2, HW)
    U_all_T = np.concatenate([_bilinear_upsample_matrix(s, H, W).T for s in setting], axis=0)  # (S2, HW)
    S2 = P_all.shape[0]

    # Fold eval-mode BN into the 1x1 conv; stack branches along the output-channel axis.
    w_list, b_list = [], []
    for p in params:
        scale = p["gamma"] / jnp.sqrt(p["run_var"] + eps)        # (R,)
        w_list.append(p["conv_w"] * scale[:, None])              # (R, C)
        b_list.append(p["beta"] - p["run_mean"] * scale)         # (R,)
    w_all = jnp.concatenate(w_list, axis=0)                      # (4R, C)
    b_all = jnp.concatenate(b_list, axis=0)[:, None]             # (4R, 1)

    # Block-diagonal mask: branch b's output channels only see its own pooled cells.
    mask = np.zeros((len(setting) * R, S2), np.float32)
    off = 0
    for b, s in enumerate(setting):
        mask[b * R:(b + 1) * R, off:off + s * s] = 1.0
        off += s * s

    x_ncl = x_nchw.reshape(N, C, HW)                             # NCHW -> channels-major flat (free)
    branches = _ppm_fused(
        x_ncl.astype(jnp.bfloat16),
        jnp.asarray(P_all.T, jnp.bfloat16),
        w_all.astype(jnp.bfloat16),
        b_all.astype(jnp.float32),
        jnp.asarray(mask),
        jnp.asarray(U_all_T, jnp.bfloat16),
        x_nchw.dtype,
    )                                                            # (N, 4R, HW)
    branches = branches.reshape(N, len(setting) * R, H, W)
    return jnp.concatenate([x_nchw, branches], axis=1)


# ---------------------------------------------------------------------------
# Pure-JAX f32 reference (same eval-mode math) for a tolerance check.
# ---------------------------------------------------------------------------
def _reference_ppm(x_nchw, params, setting, eps=1e-5):
    N, C, H, W = x_nchw.shape
    HW = H * W
    xf = x_nchw.reshape(N, C, HW)
    outs = [x_nchw]
    for s, p in zip(setting, params):
        P = jnp.asarray(_adaptive_avg_pool_matrix(H, W, s))      # (s^2, HW)
        U = jnp.asarray(_bilinear_upsample_matrix(s, H, W))      # (HW, s^2)
        scale = p["gamma"] / jnp.sqrt(p["run_var"] + eps)
        wf = p["conv_w"] * scale[:, None]
        bf = p["beta"] - p["run_mean"] * scale
        pooled = jnp.einsum("kx,ncx->nck", P, xf)                # (N, C, s^2)
        y = jnp.einsum("rc,nck->nrk", wf, pooled) + bf[None, :, None]
        y = jnp.maximum(y, 0.0)
        up = jnp.einsum("xk,nrk->nrx", U, y).reshape(N, -1, H, W)
        outs.append(up)
    return jnp.concatenate(outs, axis=1)


if __name__ == "__main__":
    key = jax.random.PRNGKey(0)
    N, C, H, W = 2, 4, 16, 16
    reduction_dim = 2
    setting = (1, 2, 3, 6)

    kx, kp = jax.random.split(key)
    x = jax.random.normal(kx, (N, C, H, W), jnp.float32)
    params = init_ppm_params(kp, C, reduction_dim, setting)

    out = jax.block_until_ready(pyramid_pooling_module(x, params, setting))
    assert out.shape == (N, C + reduction_dim * len(setting), H, W), out.shape
    assert bool(jnp.all(jnp.isfinite(out)))

    ref = jax.block_until_ready(_reference_ppm(x, params, setting))
    max_err = float(jnp.max(jnp.abs(out - ref)))
    assert max_err < 5e-2, f"max abs error {max_err}"
    print("KERNEL_OK")
</pallas_src>

<mosaic_0001>
module attributes {stable_mosaic.version = 11 : i64} {
  func.func @_ppm_fused_kernel(%arg0: i32, %arg1: i32, %arg2: memref<1x4x256xbf16, #tpu.memory_space<vmem>>, %arg3: memref<256x50xbf16, #tpu.memory_space<vmem>>, %arg4: memref<8x4xbf16, #tpu.memory_space<vmem>>, %arg5: memref<8x1xf32, #tpu.memory_space<vmem>>, %arg6: memref<8x50xf32, #tpu.memory_space<vmem>>, %arg7: memref<50x256xbf16, #tpu.memory_space<vmem>>, %arg8: memref<1x8x256xf32, #tpu.memory_space<vmem>>, %arg9: memref<8x50xf32, #tpu.memory_space<vmem>>) attributes {dimension_semantics = [#tpu.dimension_semantics<parallel>, #tpu.dimension_semantics<arbitrary>], iteration_bounds = array<i64: 2, 1>, scalar_prefetch = 0 : i64, scratch_operands = 1 : i64, tpu.core_type = #tpu.core_type<tc>, window_params = [{transform_indices = @transform_0, window_bounds = array<i64: 1, 4, 256>}, {pipeline_mode = #tpu.pipeline_mode<synchronous>, transform_indices = @transform_1, window_bounds = array<i64: 256, 50>}, {transform_indices = @transform_2, window_bounds = array<i64: 8, 4>}, {pipeline_mode = #tpu.pipeline_mode<synchronous>, transform_indices = @transform_3, window_bounds = array<i64: 8, 1>}, {pipeline_mode = #tpu.pipeline_mode<synchronous>, transform_indices = @transform_4, window_bounds = array<i64: 8, 50>}, {pipeline_mode = #tpu.pipeline_mode<synchronous>, transform_indices = @transform_5, window_bounds = array<i64: 50, 256>}, {transform_indices = @transform_6, window_bounds = array<i64: 1, 8, 256>}]} {
    %c0_i32 = arith.constant 0 : i32
    %0 = arith.cmpi eq, %arg1, %c0_i32 : i32
    %1 = arith.extui %0 : i1 to i32
    %c0_i32_0 = arith.constant 0 : i32
    %2 = arith.cmpi ne, %1, %c0_i32_0 : i32
    scf.if %2 {
      %cst_14 = arith.constant 0.000000e+00 : f32
      %16 = vector.broadcast %cst_14 : f32 to vector<8x50xf32>
      %c0_15 = arith.constant 0 : index
      %c0_16 = arith.constant 0 : index
      %17 = vector.load %arg9[%c0_15, %c0_16] : memref<8x50xf32, #tpu.memory_space<vmem>>, vector<8x50xf32>
      tpu.vector_store %arg9[%c0_15, %c0_16], %16 {strides = array<i32>} : memref<8x50xf32, #tpu.memory_space<vmem>>, vector<8x50xf32>,
    } else {
    }
    %c0 = arith.constant 0 : index
    %c0_1 = arith.constant 0 : index
    %c0_2 = arith.constant 0 : index
    %3 = vector.load %arg2[%c0, %c0_1, %c0_2] : memref<1x4x256xbf16, #tpu.memory_space<vmem>>, vector<1x4x256xbf16>
    %4 = vector.shape_cast %3 : vector<1x4x256xbf16> to vector<4x256xbf16>
    %c0_3 = arith.constant 0 : index
    %c0_4 = arith.constant 0 : index
    %5 = vector.load %arg3[%c0_3, %c0_4] : memref<256x50xbf16, #tpu.memory_space<vmem>>, vector<256x50xbf16>
    %cst = arith.constant dense<0.000000e+00> : vector<4x50xf32>
    %6 = tpu.matmul %4, %5, %cst {dimension_numbers = #tpu.dot_dimension_numbers<[1], [0], [0], [1], [0, 0, 1, 1], [], []>} : vector<4x256xbf16>, vector<256x50xbf16>, vector<4x50xf32> -> vector<4x50xf32>
    %c0_5 = arith.constant 0 : index
    %c0_6 = arith.constant 0 : index
    %7 = vector.load %arg9[%c0_5, %c0_6] : memref<8x50xf32, #tpu.memory_space<vmem>>, vector<8x50xf32>
    %c0_7 = arith.constant 0 : index
    %c0_8 = arith.constant 0 : index
    %8 = vector.load %arg4[%c0_7, %c0_8] : memref<8x4xbf16, #tpu.memory_space<vmem>>, vector<8x4xbf16>
    %9 = arith.truncf %6 : vector<4x50xf32> to vector<4x50xbf16>
    %cst_9 = arith.constant dense<0.000000e+00> : vector<8x50xf32>
    %10 = tpu.matmul %8, %9, %cst_9 {dimension_numbers = #tpu.dot_dimension_numbers<[1], [0], [0], [1], [0, 0, 1, 1], [], []>} : vector<8x4xbf16>, vector<4x50xbf16>, vector<8x50xf32> -> vector<8x50xf32>
    %11 = arith.addf %7, %10 : vector<8x50xf32>
    %c0_10 = arith.constant 0 : index
    %c0_11 = arith.constant 0 : index
    %12 = vector.load %arg9[%c0_10, %c0_11] : memref<8x50xf32, #tpu.memory_space<vmem>>, vector<8x50xf32>
    tpu.vector_store %arg9[%c0_10, %c0_11], %11 {strides = array<i32>} : memref<8x50xf32, #tpu.memory_space<vmem>>, vector<8x50xf32>,
    %c0_i32_12 = arith.constant 0 : i32
    %13 = arith.cmpi eq, %arg1, %c0_i32_12 : i32
    %14 = arith.extui %13 : i1 to i32
    %c0_i32_13 = arith.constant 0 : i32
    %15 = arith.cmpi ne, %14, %c0_i32_13 : i32
    scf.if %15 {
      %c0_14 = arith.constant 0 : index
      %c0_15 = arith.constant 0 : index
      %16 = vector.load %arg9[%c0_14, %c0_15] : memref<8x50xf32, #tpu.memory_space<vmem>>, vector<8x50xf32>
      %c0_16 = arith.constant 0 : index
      %c0_17 = arith.constant 0 : index
      %17 = vector.load %arg5[%c0_16, %c0_17] : memref<8x1xf32, #tpu.memory_space<vmem>>, vector<8x1xf32>
      %18 = vector.broadcast %17 : vector<8x1xf32> to vector<8x50xf32>
      %19 = arith.addf %16, %18 : vector<8x50xf32>
      %cst_18 = arith.constant 0.000000e+00 : f32
      %20 = vector.broadcast %cst_18 : f32 to vector<8x50xf32>
      %21 = arith.maximumf %19, %20 : vector<8x50xf32>
      %c0_19 = arith.constant 0 : index
      %c0_20 = arith.constant 0 : index
      %22 = vector.load %arg6[%c0_19, %c0_20] : memref<8x50xf32, #tpu.memory_space<vmem>>, vector<8x50xf32>
      %23 = arith.mulf %21, %22 : vector<8x50xf32>
      %24 = arith.truncf %23 : vector<8x50xf32> to vector<8x50xbf16>
      %c0_21 = arith.constant 0 : index
      %c0_22 = arith.constant 0 : index
      %25 = vector.load %arg7[%c0_21, %c0_22] : memref<50x256xbf16, #tpu.memory_space<vmem>>, vector<50x256xbf16>
      %cst_23 = arith.constant dense<0.000000e+00> : vector<8x256xf32>
      %26 = tpu.matmul %24, %25, %cst_23 {dimension_numbers = #tpu.dot_dimension_numbers<[1], [0], [0], [1], [0, 0, 1, 1], [], []>} : vector<8x50xbf16>, vector<50x256xbf16>, vector<8x256xf32> -> vector<8x256xf32>
      %c0_24 = arith.constant 0 : index
      %c0_25 = arith.constant 0 : index
      %c0_26 = arith.constant 0 : index
      %27 = vector.load %arg8[%c0_24, %c0_25, %c0_26] : memref<1x8x256xf32, #tpu.memory_space<vmem>>, vector<1x8x256xf32>
      %28 = vector.shape_cast %27 : vector<1x8x256xf32> to vector<8x256xf32>
      %29 = vector.shape_cast %26 : vector<8x256xf32> to vector<1x8x256xf32>
      tpu.vector_store %arg8[%c0_24, %c0_25, %c0_26], %29 {strides = array<i32>} : memref<1x8x256xf32, #tpu.memory_space<vmem>>, vector<1x8x256xf32>,
    } else {
    }
    return
  }
  func.func @transform_0(%arg0: i32, %arg1: i32) -> (i32, i32, i32) {
    %c0_i32 = arith.constant 0 : i32
    %c0_i32_0 = arith.constant 0 : i32
    return %arg0, %arg1, %c0_i32 : i32, i32, i32
  }
  func.func @transform_1(%arg0: i32, %arg1: i32) -> (i32, i32) {
    %c0_i32 = arith.constant 0 : i32
    %c0_i32_0 = arith.constant 0 : i32
    %c0_i32_1 = arith.constant 0 : i32
    return %c0_i32, %c0_i32_0 : i32, i32
  }
  func.func @transform_2(%arg0: i32, %arg1: i32) -> (i32, i32) {
    %c0_i32 = arith.constant 0 : i32
    %c0_i32_0 = arith.constant 0 : i32
    return %c0_i32, %arg1 : i32, i32
  }
  func.func @transform_3(%arg0: i32, %arg1: i32) -> (i32, i32) {
    %c0_i32 = arith.constant 0 : i32
    %c0_i32_0 = arith.constant 0 : i32
    %c0_i32_1 = arith.constant 0 : i32
    return %c0_i32, %c0_i32_0 : i32, i32
  }
  func.func @transform_4(%arg0: i32, %arg1: i32) -> (i32, i32) {
    %c0_i32 = arith.constant 0 : i32
    %c0_i32_0 = arith.constant 0 : i32
    %c0_i32_1 = arith.constant 0 : i32
    return %c0_i32, %c0_i32_0 : i32, i32
  }
  func.func @transform_5(%arg0: i32, %arg1: i32) -> (i32, i32) {
    %c0_i32 = arith.constant 0 : i32
    %c0_i32_0 = arith.constant 0 : i32
    %c0_i32_1 = arith.constant 0 : i32
    return %c0_i32, %c0_i32_0 : i32, i32
  }
  func.func @transform_6(%arg0: i32, %arg1: i32) -> (i32, i32, i32) {
    %c0_i32 = arith.constant 0 : i32
    %c0_i32_0 = arith.constant 0 : i32
    %c0_i32_1 = arith.constant 0 : i32
    return %arg0, %c0_i32, %c0_i32_0 : i32, i32, i32
  }
}

</mosaic_0001>

<bundles_post_ra>
// kernel: tpu_custom_call.1
= control target key start
LH: loop header
LB: loop body
LE: loop exit
PB: predicated region body
PF: predicated region fallthrough
CT: control target
= control target key end

     0   :  { %11 = vsyncpa [#allocation4], 0  ;;  %s1222_s0 = inlined_call_operand.vmem [shape: bf16[2,4,256], index: 0, kind: input, shape index: {}]   ;;  %s1223_s1 = inlined_call_operand.vmem [shape: bf16[256,50], index: 1, kind: input, shape index: {}]   ;;  %s1224_s2 = inlined_call_operand.vmem [shape: bf16[8,4], index: 2, kind: input, shape index: {}]   ;;  %s1225_s3 = inlined_call_operand.vmem [shape: f32[8,1], index: 3, kind: input, shape index: {}]   ;;  %s1226_s4 = inlined_call_operand.vmem [shape: f32[8,50], index: 4, kind: input, shape index: {}]   ;;  %s1227_s5 = inlined_call_operand.vmem [shape: bf16[50,256], index: 5, kind: input, shape index: {}]   ;;  %s1228_s6 = inlined_call_operand.hbm [shape: f32[2,8,256], index: 6, kind: output, shape index: {}]  }
   0x1   :  { %13 = vsyncpa [#allocation4 + $0x1], 0  ;;  %s1029_s21 = smov 0   ;;  %s1031_s22 = smov 0  }
   0x2   :  { %s1033_s23 = smov 0   ;;  %s1035_s24 = smov 0  }
   0x3   :  { %s1037_s25 = smov 0   ;;  %s1039_s26 = smov 0  }
   0x4 LB: > { %s750_s27 = sadd.s32 4294967295, %s988_s26   ;;  %s751_s28 = sadd.s32 4294967294, %s988_s26   ;;  %s988_s26 = sphi %s1039_s26, %s19_s26   ;;  %s984_s25 = sphi %s1037_s25, %s1235_s25   ;;  %s980_s24 = sphi %s1035_s24, %s1234_s24   ;;  %s976_s23 = sphi %s1033_s23, %s1233_s23   ;;  %s972_s22 = sphi %s1031_s22, %s1232_s22   ;;  %s968_s21 = sphi %s1029_s21, %s1231_s21  }
   0x5   : > { %s31_s29 = sadd.s32 1, %s984_s25  ;;  %s176_s30 = sadd.s32 1, %s976_s23 }
   0x6   : > { %p33_p0 = scmp.ge.s32.totalorder %s31_s29, 2  ;;  %p186_p1 = scmp.ne.s32.totalorder %s976_s23, %s972_s22 }
   0x7   : > { %p187_p2 = scmp.eq.s32.totalorder %s750_s27, 1  ;;  %p192_p3 = scmp.ne.s32.totalorder %s972_s22, %s968_s21 }
   0x8   : > { %s1237_s29 = smov (%p33_p0, %s31_s29), 0  ;;  %p193_p5 = scmp.eq.s32.totalorder %s751_s28, 1 }
   0x9   : > { %p1069_p4 = por %p187_p2, %p186_p1  ;;  %s173_s8 = ssub.s32 %s984_s25, %s1237_s29 }
   0xa   : > { %p755_p6 = scmp.ge.s32.totalorder %s988_s26, 1  ;;  %p174_p7 = scmp.eq.s32.totalorder %s173_s8, 0 }
   0xb   : > { %p1076_p8 = por %p193_p5, %p192_p3  ;;  %p242_p9 = scmp.lt.s32.totalorder %s988_s26, 3 }
   0xc   : > { %s1082_s10 = scalar_select %p174_p7, %s976_s23, %s176_s30  }
   0xd   : > { %p243_p10 = pnand %p755_p6, %p242_p9 }
   0xe   : > { %v883_v0 = vld [vmem:[%s1223_s1 + $0x40] sm:$0xff] (!%p243_p10)   ;;  %v885_v2 = vld [vmem:[%s1223_s1 + $0x48] sm:$0xff] (!%p243_p10)   ;;  %p280_p11 = scmp.lt.s32.totalorder (!%p243_p10), %s980_s24, 1  ;;  %v887_v4 = vld [vmem:[%s1223_s1 + $0x50] sm:$0xff] (!%p243_p10)   ;;  %vm298_vm0 = vcmask (!%p243_p10), 408576   ;;  %v990_v18 = vmov (!%p243_p10), 0.0  }
   0xf   : > { %246 = sbr.rel (%p243_p10) target bundleno = 726 (0x2d6), region = 44  ;;  %v884_v1 = vld [vmem:[%s1223_s1] sm:$0xff] (!%p243_p10)   ;;  %794 = vmatprep.subr.bf16.mxu0 (!%p243_p10), %v883_v0  ;;  %v886_v3 = vld [vmem:[%s1223_s1 + $0x8] sm:$0xff] (!%p243_p10)   ;;  %v888_v5 = vld [vmem:[%s1223_s1 + $0x10] sm:$0xff] (!%p243_p10)   ;;  %299 = vst.msk [vmem:[#allocation2] sm:$0xff] (!%p243_p10), %vm298_vm0, %v990_v18  ;;  %818 = vmatprep.subr.bf16.mxu1 (!%p243_p10), %v990_v18  ;;  %vm991_vm1 = vmmov (!%p243_p10), 0  }
  0x10   : > { %795 = vmatpush3.bf16.msra.mxu0 (!%p243_p10), %v884_v1  ;;  %v889_v6 = vld [vmem:[%s1223_s1 + $0x58] sm:$0xff] (!%p243_p10)   ;;  %v891_v8 = vld [vmem:[%s1223_s1 + $0x60] sm:$0xff] (!%p243_p10)   ;;  %v893_v10 = vld [vmem:[%s1223_s1 + $0x68] sm:$0xff] (!%p243_p10)   ;;  %820 = vmatprep.mubr.msk.bf16.mxu1 (!%p243_p10), %vm991_vm1, %v990_v18  ;;  %v992_v20 = vmov (!%p243_p10), 0   ;;  %vm487_vm2 = vcmask (!%p243_p10), 1041408   ;;  %vm483_vm3 = vcmask (!%p243_p10), 31744  }
  0x11   : > { %796 = vmatprep.subr.bf16.mxu0 (!%p243_p10), %v885_v2  ;;  %v890_v7 = vld [vmem:[%s1223_s1 + $0x18] sm:$0xff] (!%p243_p10)   ;;  %v892_v9 = vld [vmem:[%s1223_s1 + $0x20] sm:$0xff] (!%p243_p10)   ;;  %v894_v13 = vld [vmem:[%s1223_s1 + $0x28] sm:$0xff] (!%p243_p10)   ;;  %882 = vset.pattern.permute.xlu0 (!%p243_p10), %v992_v20  ;;  %vm594_vm4 = vcmask (!%p243_p10), 1040384   ;;  %s793_s16 = sshll.u32 (!%p243_p10), %s980_s24, 8 }
  0x12   : > { %v895_v14 = vld [vmem:[%s1223_s1 + $0x70] sm:$0xff] (!%p243_p10)   ;;  %v897_v16 = vld [vmem:[%s1223_s1 + $0x78] sm:$0xff] (!%p243_p10)   ;;  %v538_v19 = vld [vmem:[%s1225_s3] sm:$0xff] (!%p243_p10) }
  0x13   : > { %v896_v15 = vld [vmem:[%s1223_s1 + $0x30] sm:$0xff] (!%p243_p10)   ;;  %v898_v17 = vld [vmem:[%s1223_s1 + $0x38] sm:$0xff] (!%p243_p10)   ;;  %541 = vperm.xlu0 (!%p243_p10), %882, %v538_v19   ;;  %v481_v28 = vld [vmem:[%s1224_s2] sm:$0xf] (!%p243_p10) }
  0x14   : > { %797 = vmatpush3.bf16.msra.mxu0 (!%p243_p10), %v886_v3  ;;  %v901_v29 = vld [vmem:[%s1227_s5 + $0x4] ss:$8 sps:$4 sm:$0xff] (!%p243_p10)   ;;  %v899_v30 = vld [vmem:[%s1227_s5] ss:$8 sps:$4 sm:$0xff] (!%p243_p10)   ;;  %v904_v31 = vld [vmem:[%s1227_s5 + $0x14] ss:$8 sps:$4 sm:$0xff] (!%p243_p10)  }
  0x15   : > { %798 = vmatprep.subr.bf16.mxu0 (!%p243_p10), %v887_v4  ;;  %v902_v32 = vld [vmem:[%s1227_s5 + $0x10] ss:$8 sps:$4 sm:$0xff] (!%p243_p10)   ;;  %v907_v33 = vld [vmem:[%s1227_s5 + $0x24] ss:$8 sps:$4 sm:$0xff] (!%p243_p10)   ;;  %v905_v34 = vld [vmem:[%s1227_s5 + $0x20] ss:$8 sps:$4 sm:$0xff] (!%p243_p10)  }
  0x16   : > { %s281_s27 = scalar_select %p280_p11, %s980_s24, 1  ;;  %v555_v35 = vld [vmem:[%s1227_s5 + $0x30] sm:$0x11]  ;;  %v480_v39 = vld [vmem:[#allocation2] sm:$0xff] }
  0x17   : > { %v784_v36 = vcombine.high %v555_v35, %v555_v35  ;;  %v783_v37 = vcombine.low %v555_v35, %v555_v35  ;;  %v546_v48 = vld [vmem:[%s1226_s4] sm:$0xff]  ;;  %s993_s24 = smov [#allocation3]  }
  0x18   : > { %s792_s12 = sshll.u32 %s281_s27, 2  ;;  %799 = vmatpush3.bf16.msra.mxu0 %v888_v5  ;;  %s914_s27 = sshll.u32 %s993_s24, 4  ;;  %s915_s27 = int_to_ptr.vmem [resolvable:$false] %s914_s27 }
  0x19   : > { %800 = vmatprep.subr.bf16.mxu0 %v889_v6  ;;  %s288_s19 = scalar_lea.vmem %s1222_s0, %s792_s12  ;;  %v596_v38 = vsel %vm594_vm4, %v783_v37, 0  ;;  %s277_s12 = sand.u32 1, %s972_s22  }
  0x1a   : > { %v759_v11 = vld.sshfl [vmem:[%s288_s19] sm:$0x33 pattern:$0x76325410]  ;;  %s756_s13 = sshll.u32 %s277_s12, 4  ;;  %s1177_s19 = scalar_lea.hbm %s1228_s6, %s793_s16 }
  0x1b   : > { %v341_v12 = vcombine.high %v759_v11, %v759_v11  ;;  %s279_s14 = scalar_lea.vmem [#allocation3], %s756_s13  ;;  %s645_s20 = scalar_lea.sflag [#allocation4], %s277_s12 }
  0x1c   : > { %801 = vmatpush3.bf16.msra.mxu0 %v890_v7  ;;  %s659_s15 = sshll.u32 %s279_s14, 4  ;;  %s916_s30 = scalar_lea.vmem %s915_s27, 512  ;;  %s1172_s15 = int_to_ptr.vmem [resolvable:$true] %s659_s15 }
  0x1d   : > { %802 = vmatprep.subr.bf16.mxu0 %v891_v8  ;;  %472 = vmatprep.mubr.bf16.mxu0 %v341_v12  ;;  %s910_s28 = scalar_lea.vmem %s1172_s15, 256  ;;  %p917_p1 = scmp.lt.s32.totalorder %s1172_s15, %s915_s27 }
  0x1e   : > { %p911_p12 = scmp.ne.s32.totalorder %s1172_s15, %s910_s28  ;;  %p918_p2 = scmp.lt.s32.totalorder %s916_s30, %s910_s28 }
  0x20   : > { %803 = vmatpush3.bf16.msra.mxu0 %v892_v9  ;;  %p912_p13 = pnand %p911_p12, %p1069_p4  ;;  %p919_p3 = por %p918_p2, %p917_p1 }
  0x21   : > { %804 = vmatprep.subr.bf16.mxu0 %v893_v10 }
  0x22   : > { %p913_p0 = pneg %p912_p13 }
  0x24   : > { %805 = vmatpush3.bf16.msra.mxu0 %v894_v13  ;;  %p920_p5 = pnand %p919_p3, %p913_p0 }
  0x25   : > { %806 = vmatprep.subr.bf16.mxu0 %v895_v14 }
  0x28   : > { %807 = vmatpush3.bf16.msra.mxu0 %v896_v15 }
  0x29   : > { %808 = vmatprep.subr.bf16.mxu0 %v897_v16 }
  0x2c   : > { %809 = vmatpush3.bf16.msra.mxu0 %v898_v17 }
  0x2f   : > { %473 = vmatmul.mubr.bf16.vlgmr.msra.gmra.mrb[0].mxu0 %v759_v11 }
  0x92   : > { %v542_v45 = vpop.permute.xlu0 %541 }
 0x102   : > { %v810_v21 = vpop.f32.mrb[0].mxu0 }
 0x103   : > { %v811_v22 = vpop.f32.mrb[1].mxu0 }
 0x104   : > { %v812_v23 = vadd.f32 %v811_v22, %v810_v21  ;;  %v813_v24 = vpop.f32.mrb[2].mxu0 }
 0x105   : > { %v814_v25 = vpop.f32.mrb[3].mxu0 }
 0x106   : > { %v482_v26 = vpack.c.bf16 %v812_v23, %v812_v23 }
 0x108   : > { %v489_v27 = vsel %vm487_vm2, %v482_v26, 0 }
 0x109   : > { %819 = vmatpush3.bf16.msra.mxu1 %v489_v27 }
 0x10a   : > { %601 = vmatprep.subr.bf16.mxu1 %v901_v29 }
 0x10c   : > { %821 = vmatmul.mubr.msk.bf16.vlgmr.msra.gmra.mrb[0].mxu1 %vm483_vm3, %v481_v28 }
 0x10d   : > { %633 = vmatprep.mubr.bf16.mxu1 %v992_v20  ;;  %602 = vmatpush1.bf16.msra.mxu1 %v899_v30 }
 0x10e   : > { %603 = vmatprep.subr.bf16.mxu1 %v904_v31 }
 0x111   : > { %604 = vmatpush1.bf16.msra.mxu1 %v902_v32 }
 0x112   : > { %605 = vmatprep.subr.bf16.mxu1 %v907_v33 }
 0x115   : > { %606 = vmatpush1.bf16.msra.mxu1 %v905_v34 }
 0x116   : > { %785 = vmatprep.subr.msk.bf16.mxu1 %vm594_vm4, %v784_v36 }
 0x119   : > { %608 = vmatpush1.bf16.msra.mxu1 %v596_v38 }
 0x1df   : > { %v525_v40 = vpop.f32.mrb[0].mxu1 }
 0x1e0   : > { %v531_v41 = vadd.f32 %v525_v40, %v480_v39  ;;  %v822_v42 = vpop.f32.mrb[1].mxu1 }
 0x1e1   : > { %v528_v43 = vpop.f32.mrb[2].mxu1 }
 0x1e2   : > { %533 = vst.msk [vmem:[#allocation2] sm:$0xff] %vm298_vm0, %v531_v41  ;;  %v823_v44 = vpop.f32.mrb[3].mxu1 }
 0x1e9   : > { %v537_v46 = vld [vmem:[#allocation2] sm:$0xff] }
 0x1ea   : > { %v544_v47 = vadd.f32 %v542_v45, %v537_v46 }
 0x1ec   : > { %v545_v49 = vmax.f32 %v544_v47, 0.0 }
 0x1ee   : > { %v547_v50 = vmul.f32 %v546_v48, %v545_v49 }
 0x1f0   : > { %v548_v51 = vpack.c.bf16 %v547_v50, %v547_v50 }
 0x1f2   : > { %786 = vmatmul.mubr.msk.bf16.vlgmr.msra.gmra.mrb[4].mxu1 %vm298_vm0, %v548_v51 }
 0x2c5   : > { %v635_v52 = vpop.f32.mrb[4].mxu1 }
 0x2c6   : > { %642 = vst [vmem:[%s279_s14] sm:$0xff] %v635_v52  ;;  %v637_v53 = vpop.f32.mrb[5].mxu1 }
 0x2c7   : > { %643 = vst [vmem:[%s279_s14 + $0x8] sm:$0xff] %v637_v53  ;;  %v639_v54 = vpop.f32.mrb[6].mxu1 }
 0x2c8   : > { %v640_v55 = vpop.f32.mrb[7].mxu1 }
 0x2c9   : > { %923 = shalt.err (!%p920_p5)
}
 0x2ca   : > { %s924_s8 = scalar_lea.hbm %s1177_s19, 256  ;;  %s928_s13 = scalar_lea.hbm %s1228_s6, 512 }
 0x2cb   : > { %p925_p6 = scmp.ne.s32.totalorder %s1177_s19, %s924_s8  ;;  %p929_p10 = scmp.lt.u32.totalorder %s1177_s19, %s1228_s6 }
 0x2cc   : > { %p930_p11 = scmp.lt.u32.totalorder %s928_s13, %s924_s8  ;;  %p932_p13 = scmp.lt.u32.totalorder %s924_s8, %s1177_s19 }
 0x2cd   : > { %p926_p7 = pnand %p925_p6, %p1069_p4 }
 0x2ce   : > { %p931_p12 = por %p930_p11, %p929_p10 }
 0x2cf   : > { %p927_p9 = pneg %p926_p7 }
 0x2d0   : > { %p933_p0 = por %p932_p13, %p931_p12 }
 0x2d2   : > { %p934_p1 = pnand %p933_p0, %p927_p9 }
 0x2d4   : > { %937 = shalt.err (!%p934_p1)
}
 0x2d5   : > { %824 = dma.vmem_to_hbm [thread:$0]  (%p1069_p4), %s1172_s15, 256, %s1177_s19, %s645_s20  }
 0x2d6 PF: > { %p830_p2 = scmp.ge.s32.totalorder %s988_s26, 2  ;;  %s671_s17 = sand.u32 1, %s968_s21  }
 0x2d7   : > { %s672_s18 = scalar_lea.sflag [#allocation4], %s671_s17 }
 0x2d8   : > { %p827_p3 = pnand %p830_p2, %p1076_p8 }
 0x2da   : > { %963 = dma.done.wait (!%p827_p3), %s672_s18, 256  }
 0x2db   : > { %965 = vsyncadd (!%p827_p3), %s672_s18, 4294967040  ;;  %s19_s26 = sadd.s32 1, %s988_s26   ;;  %s1231_s21 = smov %s972_s22 }
 0x2dc   : > { %p16_p5 = scmp.ge.s32.totalorder %s19_s26, 4   ;;  %s1232_s22 = smov %s976_s23 }
 0x2dd   : > { %s1233_s23 = smov %s1082_s10  ;;  %s1234_s24 = smov %s984_s25 }
 0x2de   : > { %s1235_s25 = smov %s1237_s29  ;;  %18 = sbr.rel (!%p16_p5) target bundleno = 4 (0x4), region = 90 }
 0x2e5   :  { %677 = vsyncpa [#allocation4], 1 }
 0x2e6   :  { %679 = vsyncpa [#allocation4 + $0x1], 1 }

</bundles_post_ra>
